<compile_context>
chip_gen: v6e
topology: v6e:2x2x1
jax: 0.10.0
libtpu: 0.0.40
codegen_flags: <defaults>
</compile_context>

<pallas_src>
import functools

import jax
import jax.numpy as jnp
from jax.experimental import pallas as pl
from jax.experimental.pallas import tpu as pltpu

SUBLANE = 8     # TPU sublane width: batch tiles / hidden padded to multiples of 8


def _round_up(n: int, m: int) -> int:
    return ((n + m - 1) // m) * m


def _cdiv(a: int, b: int) -> int:
    return -(-a // b)


def critic_kernel(x_ref, w1_ref, b1_ref, w2_ref, b2_ref, o_ref):
    # Two MXU matmuls (f32 accumulation) + VPU bias/ReLU, all on VMEM tiles.
    x = x_ref[...].astype(w1_ref.dtype)
    h = jnp.dot(x, w1_ref[...], preferred_element_type=jnp.float32) + b1_ref[...]
    h = jnp.maximum(h, 0.0)                                   # ReLU (f32 on VPU)
    y = jnp.dot(h.astype(w2_ref.dtype), w2_ref[...],
                preferred_element_type=jnp.float32) + b2_ref[...]
    o_ref[...] = y.astype(o_ref.dtype)


def prepare_critic_params(w1, b1, w2, b2, compute_dtype=jnp.float32):
    """One-time layout prep (hoisted out of the per-call hot path).

    w1: (hidden, input), w2: (output, hidden)  -- PyTorch nn.Linear layout.
    Returns pre-transposed parameters with hidden padded to a multiple of 8
    (sublane); the output dim is NOT padded (narrow HBM output).
    Zero-padded hidden rows/columns are numerically inert (ReLU(0)=0, 0*w=0).
    """
    hidden, in_size = w1.shape
    out, _ = w2.shape
    hid_p = _round_up(hidden, SUBLANE)

    w1_t = jnp.zeros((in_size, hid_p), compute_dtype)
    w1_t = w1_t.at[:, :hidden].set(jnp.transpose(w1).astype(compute_dtype))
    b1_p = jnp.zeros((1, hid_p), jnp.float32)
    b1_p = b1_p.at[:, :hidden].set(b1.astype(jnp.float32)[None, :])

    w2_t = jnp.zeros((hid_p, out), compute_dtype)
    w2_t = w2_t.at[:hidden, :].set(jnp.transpose(w2).astype(compute_dtype))
    b2_p = b2.astype(jnp.float32)[None, :]                    # (1, out)

    return (w1_t, b1_p, w2_t, b2_p)


@functools.partial(jax.jit, static_argnames=("tile_b",))
def critic_forward_prepared(x, params, *, tile_b=1024):
    """x: (B, input_size); params from prepare_critic_params."""
    w1_t, b1_p, w2_t, b2_p = params
    B, in_size = x.shape
    hid_p = w1_t.shape[1]
    out = w2_t.shape[1]

    # Batch tile: multiple of the 8-row sublane.  Clamp so (a) it never exceeds
    # the (rounded-up) batch, and (b) the grid has >= 2 steps when the batch
    # allows it, so the "parallel" axis actually feeds both TCs on v7x.
    tile_b = max(SUBLANE, min(tile_b, _round_up(B, SUBLANE)))
    if B > 2 * SUBLANE:
        tile_b = min(tile_b, _round_up(_cdiv(B, 2), SUBLANE))
    tile_b = _round_up(tile_b, SUBLANE)
    nb = _cdiv(B, tile_b)          # ragged last block handled by Pallas:
                                   # OOB rows are independent & never stored.

    itemsize = x.dtype.itemsize
    flops = 2 * B * (in_size * hid_p + hid_p * out)
    bytes_accessed = (B * in_size * itemsize
                      + w1_t.size * w1_t.dtype.itemsize
                      + w2_t.size * w2_t.dtype.itemsize
                      + (b1_p.size + b2_p.size) * 4
                      + B * out * 4)

    y = pl.pallas_call(
        critic_kernel,
        out_shape=jax.ShapeDtypeStruct((B, out), jnp.float32),
        grid_spec=pltpu.PrefetchScalarGridSpec(
            num_scalar_prefetch=0,
            grid=(nb,),
            in_specs=[
                pl.BlockSpec((tile_b, in_size), lambda i: (i, 0)),  # x: streamed
                pl.BlockSpec((in_size, hid_p), lambda i: (0, 0)),   # w1: resident
                pl.BlockSpec((1, hid_p), lambda i: (0, 0)),         # b1: resident
                pl.BlockSpec((hid_p, out), lambda i: (0, 0)),       # w2: resident
                pl.BlockSpec((1, out), lambda i: (0, 0)),           # b2: resident
            ],
            out_specs=pl.BlockSpec((tile_b, out), lambda i: (i, 0)),  # narrow store
        ),
        compiler_params=pltpu.CompilerParams(
            dimension_semantics=("parallel",)),   # 2 TCs on v7x; no-op v5e/v6e
        cost_estimate=pl.CostEstimate(
            flops=flops, transcendentals=0, bytes_accessed=bytes_accessed),
    )(x, w1_t, b1_p, w2_t, b2_p)

    return y


def critic_forward(x, w1, b1, w2, b2, *, tile_b=1024, compute_dtype=jnp.float32):
    """Convenience one-shot wrapper (PyTorch-layout weights). For repeated
    inference, call prepare_critic_params once and reuse the result.
    compute_dtype=jnp.bfloat16 halves weight/x MXU-input traffic on v6e/v7x
    (f32 accumulation is preserved); default f32 matches the PyTorch module."""
    params = prepare_critic_params(w1, b1, w2, b2, compute_dtype)
    return critic_forward_prepared(x, params, tile_b=tile_b)


def _ref_forward(x, w1, b1, w2, b2):
    h = jnp.maximum(x @ w1.T + b1, 0.0)
    return h @ w2.T + b2


if __name__ == "__main__":
    # Small shapes consistent with the module's forward.
    batch, input_size, hidden_size, output_size = 4, 16, 32, 8

    key = jax.random.PRNGKey(0)
    k_x, k_w1, k_b1, k_w2, k_b2 = jax.random.split(key, 5)

    bound1 = 1.0 / jnp.sqrt(jnp.float32(input_size))
    bound2 = 1.0 / jnp.sqrt(jnp.float32(hidden_size))
    x = jax.random.normal(k_x, (batch, input_size), dtype=jnp.float32)
    w1 = jax.random.uniform(k_w1, (hidden_size, input_size), jnp.float32, -bound1, bound1)
    b1 = jax.random.uniform(k_b1, (hidden_size,), jnp.float32, -bound1, bound1)
    w2 = jax.random.uniform(k_w2, (output_size, hidden_size), jnp.float32, -bound2, bound2)
    b2 = jax.random.uniform(k_b2, (output_size,), jnp.float32, -bound2, bound2)

    # One-time param prep (transpose + sublane padding) hoisted out of hot path.
    params = prepare_critic_params(w1, b1, w2, b2)

    y = critic_forward_prepared(x, params)
    y = jax.block_until_ready(y)
    y_ref = _ref_forward(x, w1, b1, w2, b2)
    assert y.shape == (batch, output_size)
    assert jnp.allclose(y, y_ref, atol=1e-5, rtol=1e-5), "mismatch vs reference (single tile)"

    # Multi-tile sanity check: batch not divisible by the tile -> ragged grid.
    x_big = jax.random.normal(jax.random.PRNGKey(1), (44, input_size), dtype=jnp.float32)
    y_big = jax.block_until_ready(critic_forward_prepared(x_big, params, tile_b=16))
    y_big_ref = _ref_forward(x_big, w1, b1, w2, b2)
    assert y_big.shape == (44, output_size)
    assert jnp.allclose(y_big, y_big_ref, atol=1e-5, rtol=1e-5), "mismatch vs reference (tiled)"

    print("KERNEL_OK")
</pallas_src>

<mosaic_0001>
module attributes {stable_mosaic.version = 11 : i64} {
  func.func @critic_kernel(%arg0: i32, %arg1: memref<8x16xf32, #tpu.memory_space<vmem>>, %arg2: memref<16x32xf32, #tpu.memory_space<vmem>>, %arg3: memref<1x32xf32, #tpu.memory_space<vmem>>, %arg4: memref<32x8xf32, #tpu.memory_space<vmem>>, %arg5: memref<1x8xf32, #tpu.memory_space<vmem>>, %arg6: memref<8x8xf32, #tpu.memory_space<vmem>>) attributes {dimension_semantics = [#tpu.dimension_semantics<parallel>], iteration_bounds = array<i64: 1>, scalar_prefetch = 0 : i64, scratch_operands = 0 : i64, tpu.core_type = #tpu.core_type<tc>, window_params = [{transform_indices = @transform_0, window_bounds = array<i64: 8, 16>}, {pipeline_mode = #tpu.pipeline_mode<synchronous>, transform_indices = @transform_1, window_bounds = array<i64: 16, 32>}, {pipeline_mode = #tpu.pipeline_mode<synchronous>, transform_indices = @transform_2, window_bounds = array<i64: 1, 32>}, {pipeline_mode = #tpu.pipeline_mode<synchronous>, transform_indices = @transform_3, window_bounds = array<i64: 32, 8>}, {pipeline_mode = #tpu.pipeline_mode<synchronous>, transform_indices = @transform_4, window_bounds = array<i64: 1, 8>}, {transform_indices = @transform_5, window_bounds = array<i64: 8, 8>}]} {
    %c0 = arith.constant 0 : index
    %c0_0 = arith.constant 0 : index
    %0 = vector.load %arg1[%c0, %c0_0] : memref<8x16xf32, #tpu.memory_space<vmem>>, vector<8x16xf32>
    %c0_1 = arith.constant 0 : index
    %c0_2 = arith.constant 0 : index
    %1 = vector.load %arg2[%c0_1, %c0_2] : memref<16x32xf32, #tpu.memory_space<vmem>>, vector<16x32xf32>
    %cst = arith.constant dense<0.000000e+00> : vector<8x32xf32>
    %2 = tpu.matmul %0, %1, %cst {dimension_numbers = #tpu.dot_dimension_numbers<[1], [0], [0], [1], [0, 0, 1, 1], [], []>} : vector<8x16xf32>, vector<16x32xf32>, vector<8x32xf32> -> vector<8x32xf32>
    %c0_3 = arith.constant 0 : index
    %c0_4 = arith.constant 0 : index
    %3 = vector.load %arg3[%c0_3, %c0_4] : memref<1x32xf32, #tpu.memory_space<vmem>>, vector<1x32xf32>
    %4 = vector.broadcast %3 : vector<1x32xf32> to vector<8x32xf32>
    %5 = arith.addf %2, %4 : vector<8x32xf32>
    %cst_5 = arith.constant 0.000000e+00 : f32
    %6 = vector.broadcast %cst_5 : f32 to vector<8x32xf32>
    %7 = arith.maximumf %5, %6 : vector<8x32xf32>
    %c0_6 = arith.constant 0 : index
    %c0_7 = arith.constant 0 : index
    %8 = vector.load %arg4[%c0_6, %c0_7] : memref<32x8xf32, #tpu.memory_space<vmem>>, vector<32x8xf32>
    %cst_8 = arith.constant dense<0.000000e+00> : vector<8x8xf32>
    %9 = tpu.matmul %7, %8, %cst_8 {dimension_numbers = #tpu.dot_dimension_numbers<[1], [0], [0], [1], [0, 0, 1, 1], [], []>} : vector<8x32xf32>, vector<32x8xf32>, vector<8x8xf32> -> vector<8x8xf32>
    %c0_9 = arith.constant 0 : index
    %c0_10 = arith.constant 0 : index
    %10 = vector.load %arg5[%c0_9, %c0_10] : memref<1x8xf32, #tpu.memory_space<vmem>>, vector<1x8xf32>
    %11 = vector.broadcast %10 : vector<1x8xf32> to vector<8x8xf32>
    %12 = arith.addf %9, %11 : vector<8x8xf32>
    %c0_11 = arith.constant 0 : index
    %c0_12 = arith.constant 0 : index
    %13 = vector.load %arg6[%c0_11, %c0_12] : memref<8x8xf32, #tpu.memory_space<vmem>>, vector<8x8xf32>
    tpu.vector_store %arg6[%c0_11, %c0_12], %12 {strides = array<i32>} : memref<8x8xf32, #tpu.memory_space<vmem>>, vector<8x8xf32>,
    return
  }
  func.func @transform_0(%arg0: i32) -> (i32, i32) {
    %c0_i32 = arith.constant 0 : i32
    %c0_i32_0 = arith.constant 0 : i32
    return %arg0, %c0_i32 : i32, i32
  }
  func.func @transform_1(%arg0: i32) -> (i32, i32) {
    %c0_i32 = arith.constant 0 : i32
    %c0_i32_0 = arith.constant 0 : i32
    %c0_i32_1 = arith.constant 0 : i32
    return %c0_i32, %c0_i32_0 : i32, i32
  }
  func.func @transform_2(%arg0: i32) -> (i32, i32) {
    %c0_i32 = arith.constant 0 : i32
    %c0_i32_0 = arith.constant 0 : i32
    %c0_i32_1 = arith.constant 0 : i32
    return %c0_i32, %c0_i32_0 : i32, i32
  }
  func.func @transform_3(%arg0: i32) -> (i32, i32) {
    %c0_i32 = arith.constant 0 : i32
    %c0_i32_0 = arith.constant 0 : i32
    %c0_i32_1 = arith.constant 0 : i32
    return %c0_i32, %c0_i32_0 : i32, i32
  }
  func.func @transform_4(%arg0: i32) -> (i32, i32) {
    %c0_i32 = arith.constant 0 : i32
    %c0_i32_0 = arith.constant 0 : i32
    %c0_i32_1 = arith.constant 0 : i32
    return %c0_i32, %c0_i32_0 : i32, i32
  }
  func.func @transform_5(%arg0: i32) -> (i32, i32) {
    %c0_i32 = arith.constant 0 : i32
    %c0_i32_0 = arith.constant 0 : i32
    return %arg0, %c0_i32 : i32, i32
  }
}

</mosaic_0001>

<bundles_post_ra>
// kernel: critic_forward_prepared.1
= control target key start
LH: loop header
LB: loop body
LE: loop exit
PB: predicated region body
PF: predicated region fallthrough
CT: control target
= control target key end

     0   :  { %10 = vsyncpa [#allocation3], 0  ;;  %v266_v1 = vmov 0.0   ;;  %vm267_vm0 = vmmov 0   ;;  %vm31_vm1 = vcmask 130048   ;;  %vm117_vm2 = vcmask 261120   ;;  %s331_s0 = inlined_call_operand.vmem [shape: f32[4,16], index: 0, kind: input, shape index: {}]   ;;  %s332_s1 = inlined_call_operand.vmem [shape: f32[16,32], index: 1, kind: input, shape index: {}]   ;;  %s333_s2 = inlined_call_operand.vmem [shape: f32[1,32], index: 2, kind: input, shape index: {}]   ;;  %s334_s3 = inlined_call_operand.vmem [shape: f32[32,8], index: 3, kind: input, shape index: {}]   ;;  %s335_s4 = inlined_call_operand.vmem [shape: f32[1,8], index: 4, kind: input, shape index: {}]   ;;  %s336_s5 = inlined_call_operand.hbm [shape: f32[4,8], index: 5, kind: output, shape index: {}]  }
   0x1   :  { %v23_v0 = vld [vmem:[%s332_s1 + $0x8] sm:$0xff]  ;;  %221 = vmatprep.subr.mxu0 %v266_v1  ;;  %v22_v2 = vld [vmem:[%s332_s1] sm:$0xff]  ;;  %225 = vmatprep.mubr.msk.f32.mxu0 %vm267_vm0, %v266_v1  ;;  %v109_v3 = vld [vmem:[%s334_s3 + $0x18] sm:$0xff]  ;;  %vm191_vm3 = vcmask 64512  }
   0x2   :  { %222 = vmatpush3.msra.mxu0 %v23_v0  ;;  %v21_v4 = vld [vmem:[%s331_s0] sm:$0xff]  ;;  %228 = vmatprep.subr.mxu1 %v266_v1  ;;  %v108_v5 = vld [vmem:[%s334_s3 + $0x10] sm:$0xff]  ;;  %v107_v6 = vld [vmem:[%s334_s3 + $0x8] sm:$0xff] }
   0x3   :  { %223 = vmatprep.subr.mxu0 %v266_v1  ;;  %229 = vmatpush3.msra.mxu1 %v109_v3  ;;  %v106_v7 = vld [vmem:[%s334_s3] sm:$0xff] }
   0x4   :  { %224 = vmatpush3.msra.mxu0 %v22_v2  ;;  %230 = vmatprep.subr.mxu1 %v266_v1  ;;  %v209_v8 = vld [vmem:[%s333_s2] ss:$0 sm:$0xff] }
   0x5   :  { %226 = vmatmul.mubr.msk.f32.vlgmr.msra.gmra.mxu0 %vm31_vm1, %v21_v4  ;;  %236 = vmatprep.mubr.msk.f32.mxu1 %vm267_vm0, %v266_v1  ;;  %v211_v13 = vld [vmem:[%s335_s4] ss:$0 sm:$0xff] }
   0x6   :  { %231 = vmatpush3.msra.mxu1 %v108_v5 }
   0x7   :  { %232 = vmatprep.subr.mxu1 %v266_v1 }
   0x8   :  { %233 = vmatpush3.msra.mxu1 %v107_v6 }
   0x9   :  { %234 = vmatprep.subr.mxu1 %v266_v1 }
   0xa   :  { %235 = vmatpush3.msra.mxu1 %v106_v7 }
  0xc5   :  { %v101_v9 = vpop.f32.mrf.mxu0 }
  0xc6   :  { %v102_v10 = vadd.f32 %v209_v8, %v101_v9 }
  0xc7   :  { %v227_v11 = vpop.f32.mrf.mxu0 }
  0xc8   :  { %v105_v12 = vmax.f32 %v102_v10, 0.0 }
  0xca   :  { %237 = vmatmul.mubr.msk.f32.vlgmr.msra.gmra.mxu1 %vm117_vm2, %v105_v12 }
 0x18a   :  { %v187_v14 = vpop.f32.mrf.mxu1 }
 0x18b   :  { %v188_v15 = vadd.f32 %v211_v13, %v187_v14 }
 0x18c   :  { %v238_v16 = vpop.f32.mrf.mxu1 }
 0x18d   :  { %192 = vst.msk [vmem:[#allocation2] sm:$0xff] %vm191_vm3, %v188_v15 }
 0x18e   :  { %197 = vsyncadd [#allocation3], 64  ;;  %s268_s3 = smov [#allocation2]  }
 0x18f   :  { %s198_s9 = sshll.u32 %s268_s3, 4  ;;  %s199_s9 = int_to_ptr.vmem [resolvable:$true] %s198_s9 }
 0x190   :  { %s244_s2 = scalar_lea.vmem %s199_s9, 64  ;;  %s248_s10 = scalar_lea.vmem %s199_s9, 128 }
 0x191   :  { %p245_p0 = scmp.ne.s32.totalorder %s199_s9, %s244_s2  ;;  %p249_p1 = scmp.lt.s32.totalorder %s199_s9, %s199_s9 }
 0x192   :  { %p250_p2 = scmp.lt.s32.totalorder %s248_s10, %s244_s2 }
 0x194   :  { %p251_p3 = por %p250_p2, %p249_p1 }
 0x196   :  { %p252_p4 = pnand %p251_p3, %p245_p0 }
 0x198   :  { %255 = shalt.err (!%p252_p4)
}
 0x199   :  { %s269_s11 = smov 64   ;;  %s270_s12 = smov 4  }
 0x19a   :  { %204 = dma.vmem_to_hbm [thread:$0]  %s199_s9, 64, %s336_s5, [#allocation3], %s269_s11, %s269_s11, %s270_s12  }
 0x19b   :  { %264 = dma.done.wait [#allocation3], 128  }
 0x19c   :  { %265 = vsyncadd [#allocation3], 4294967168 }
 0x19d   :  { %208 = vsyncpa [#allocation3], 1 }

</bundles_post_ra>
